<compile_context>
chip_gen: v5e
topology: v5e:2x2
jax: 0.10.0
libtpu: 0.0.40
codegen_flags: <defaults>
</compile_context>

<pallas_src>
import functools

import jax
import jax.numpy as jnp
from jax import lax
from jax.experimental import pallas as pl
from jax.experimental.pallas import tpu as pltpu


def _softmax_loss_kernel(pred_ref, true_ref, out_ref, acc_ref, *,
                         inv_tau, n_rows, tile_n):
    pid = pl.program_id(0)

    @pl.when(pid == 0)
    def _init():
        acc_ref[...] = jnp.zeros_like(acc_ref)

    # (TILE_N, C) tile: upcast + temperature scale (multiply, not divide).
    logits = pred_ref[...].astype(jnp.float32) * inv_tau
    tn, c = logits.shape

    # Single shifted tensor feeds both the logsumexp and the target gather.
    m = jnp.max(logits, axis=-1, keepdims=True)                       # (TILE_N, 1)
    shifted = logits - m                                              # (TILE_N, C)
    lse_shift = jnp.log(jnp.sum(jnp.exp(shifted), axis=-1, keepdims=True))

    col_ids = lax.broadcasted_iota(jnp.int32, (tn, c), 1)             # (TILE_N, C)
    onehot = col_ids == true_ref[...]                                 # (TILE_N, C)
    target_shift = jnp.sum(jnp.where(onehot, shifted, 0.0),
                           axis=-1, keepdims=True)                    # (TILE_N, 1)

    per_row = lse_shift - target_shift                                # (TILE_N, 1)

    # Mask padded rows of the (possibly ragged) last block.
    row_ids = lax.broadcasted_iota(jnp.int32, (tn, 1), 0) + pid * tile_n
    per_row = jnp.where(row_ids < n_rows, per_row, 0.0)

    acc_ref[...] = acc_ref[...] + jnp.sum(per_row, keepdims=True)     # (1, 1)

    @pl.when(pid == pl.num_programs(0) - 1)
    def _finalize():
        # reduction='mean' (PyTorch CrossEntropyLoss default)
        out_ref[...] = acc_ref[...] * (1.0 / n_rows)


_MAX_TILE_N = 512  # rows/block: 2 buffers x 512 x C x 4B stays well under scoped VMEM


def softmax_loss(pred, true, tau=1.0):
    """Equivalent of SoftmaxLoss(tau)(pred, true) with reduction='mean'."""
    n, c = pred.shape
    true2 = true.reshape(n, 1).astype(jnp.int32)

    # Full-array block when small (block dims equal array dims -> no (8,128)
    # constraint); otherwise 512-row tiles (multiple of 8 f32 sublanes).
    tile_n = n if n <= _MAX_TILE_N else _MAX_TILE_N
    num_tiles = pl.cdiv(n, tile_n)

    kernel = functools.partial(_softmax_loss_kernel,
                               inv_tau=float(1.0 / tau),
                               n_rows=n, tile_n=tile_n)

    out = pl.pallas_call(
        kernel,
        out_shape=jax.ShapeDtypeStruct((1, 1), jnp.float32),
        grid_spec=pltpu.PrefetchScalarGridSpec(
            num_scalar_prefetch=0,
            grid=(num_tiles,),
            in_specs=[
                pl.BlockSpec((tile_n, c), lambda i: (i, 0)),
                pl.BlockSpec((tile_n, 1), lambda i: (i, 0)),
            ],
            out_specs=pl.BlockSpec((1, 1), lambda i: (0, 0)),
            scratch_shapes=[pltpu.VMEM((1, 1), jnp.float32)],
        ),
        # Scalar accumulator serializes the batch axis.
        # TODO(synk): for v7x megacore, emit per-tile partial sums on a
        # 'parallel' axis (reduce in the wrapper); for vocab-scale C, add a
        # trailing 'arbitrary' C-tile axis with an online (flash) logsumexp.
        compiler_params=pltpu.CompilerParams(
            dimension_semantics=("arbitrary",)),
    )(pred, true2)
    return out[0, 0]


def _reference(pred, true, tau=1.0):
    logits = pred.astype(jnp.float32) / tau
    logz = jax.scipy.special.logsumexp(logits, axis=-1)
    tgt = jnp.take_along_axis(logits, true[:, None].astype(jnp.int32), axis=-1)[:, 0]
    return jnp.mean(logz - tgt)


if __name__ == "__main__":
    key = jax.random.PRNGKey(0)
    k1, k2, k3, k4 = jax.random.split(key, 4)

    # Small case matching the module convention: batch=8, classes=32.
    N, C = 8, 32
    pred = jax.random.normal(k1, (N, C), dtype=jnp.float32)
    true = jax.random.randint(k2, (N,), 0, C, dtype=jnp.int32)

    for tau in (1.0, 0.5):
        loss = softmax_loss(pred, true, tau=tau)
        jax.block_until_ready(loss)
        ref = _reference(pred, true, tau=tau)
        assert jnp.allclose(loss, ref, atol=1e-5, rtol=1e-5), (tau, loss, ref)

    # Tiled case exercising the grid, accumulator and ragged-tail masking
    # (1100 rows -> 3 x 512-row blocks, last block has 76 valid rows).
    N2, C2 = 1100, 160
    pred2 = jax.random.normal(k3, (N2, C2), dtype=jnp.float32)
    true2 = jax.random.randint(k4, (N2,), 0, C2, dtype=jnp.int32)
    loss2 = softmax_loss(pred2, true2, tau=0.7)
    jax.block_until_ready(loss2)
    ref2 = _reference(pred2, true2, tau=0.7)
    assert jnp.allclose(loss2, ref2, atol=1e-4, rtol=1e-4), (loss2, ref2)

    print("KERNEL_OK")
</pallas_src>

<mosaic_0001>
module attributes {stable_mosaic.version = 11 : i64} {
  func.func @_softmax_loss_kernel(%arg0: i32, %arg1: memref<8x32xf32, #tpu.memory_space<vmem>>, %arg2: memref<8x1xi32, #tpu.memory_space<vmem>>, %arg3: memref<1x1xf32, #tpu.memory_space<vmem>>, %arg4: memref<1x1xf32, #tpu.memory_space<vmem>>) attributes {dimension_semantics = [#tpu.dimension_semantics<arbitrary>], iteration_bounds = array<i64: 1>, scalar_prefetch = 0 : i64, scratch_operands = 1 : i64, tpu.core_type = #tpu.core_type<tc>, window_params = [{transform_indices = @transform_0, window_bounds = array<i64: 8, 32>}, {transform_indices = @transform_1, window_bounds = array<i64: 8, 1>}, {pipeline_mode = #tpu.pipeline_mode<synchronous>, transform_indices = @transform_2, window_bounds = array<i64: 1, 1>}]} {
    %c0_i32 = arith.constant 0 : i32
    %0 = arith.cmpi eq, %arg0, %c0_i32 : i32
    %1 = arith.extui %0 : i1 to i32
    %c0_i32_0 = arith.constant 0 : i32
    %2 = arith.cmpi ne, %1, %c0_i32_0 : i32
    scf.if %2 {
      %cst_17 = arith.constant 0.000000e+00 : f32
      %42 = vector.broadcast %cst_17 : f32 to vector<1x1xf32>
      %c0_18 = arith.constant 0 : index
      %c0_19 = arith.constant 0 : index
      %43 = vector.load %arg4[%c0_18, %c0_19] : memref<1x1xf32, #tpu.memory_space<vmem>>, vector<1x1xf32>
      tpu.vector_store %arg4[%c0_18, %c0_19], %42 {strides = array<i32>} : memref<1x1xf32, #tpu.memory_space<vmem>>, vector<1x1xf32>,
    } else {
    }
    %c0 = arith.constant 0 : index
    %c0_1 = arith.constant 0 : index
    %3 = vector.load %arg1[%c0, %c0_1] : memref<8x32xf32, #tpu.memory_space<vmem>>, vector<8x32xf32>
    %cst = arith.constant 1.000000e+00 : f32
    %4 = vector.broadcast %cst : f32 to vector<8x32xf32>
    %5 = arith.mulf %3, %4 : vector<8x32xf32>
    %cst_2 = arith.constant dense<0xFF800000> : vector<8xf32>
    %6 = vector.multi_reduction <maximumf>, %5, %cst_2 [1] : vector<8x32xf32> to vector<8xf32>
    %7 = vector.shape_cast %6 : vector<8xf32> to vector<8x1xf32>
    %8 = vector.broadcast %7 : vector<8x1xf32> to vector<8x32xf32>
    %9 = arith.subf %5, %8 : vector<8x32xf32>
    %10 = math.exp %9 : vector<8x32xf32>
    %cst_3 = arith.constant dense<0.000000e+00> : vector<8xf32>
    %11 = vector.multi_reduction <add>, %10, %cst_3 [1] : vector<8x32xf32> to vector<8xf32>
    %12 = vector.shape_cast %11 : vector<8xf32> to vector<8x1xf32>
    %13 = math.log %12 : vector<8x1xf32>
    %14 = tpu.iota {dimensions = array<i32: 1>} : vector<8x32xi32>
    %c0_4 = arith.constant 0 : index
    %c0_5 = arith.constant 0 : index
    %15 = vector.load %arg2[%c0_4, %c0_5] : memref<8x1xi32, #tpu.memory_space<vmem>>, vector<8x1xi32>
    %16 = vector.broadcast %15 : vector<8x1xi32> to vector<8x32xi32>
    %17 = arith.cmpi eq, %14, %16 : vector<8x32xi32>
    %cst_6 = arith.constant 0.000000e+00 : f32
    %18 = vector.broadcast %cst_6 : f32 to vector<8x32xf32>
    %19 = arith.select %17, %9, %18 : vector<8x32xi1>, vector<8x32xf32>
    %cst_7 = arith.constant dense<0.000000e+00> : vector<8xf32>
    %20 = vector.multi_reduction <add>, %19, %cst_7 [1] : vector<8x32xf32> to vector<8xf32>
    %21 = vector.shape_cast %20 : vector<8xf32> to vector<8x1xf32>
    %22 = arith.subf %13, %21 : vector<8x1xf32>
    %23 = tpu.iota {dimensions = array<i32: 0>} : vector<8x1xi32>
    %c8_i32 = arith.constant 8 : i32
    %24 = arith.muli %arg0, %c8_i32 : i32
    %25 = vector.broadcast %24 : i32 to vector<8x1xi32>
    %26 = arith.addi %23, %25 : vector<8x1xi32>
    %c8_i32_8 = arith.constant 8 : i32
    %27 = vector.broadcast %c8_i32_8 : i32 to vector<8x1xi32>
    %28 = arith.cmpi slt, %26, %27 : vector<8x1xi32>
    %cst_9 = arith.constant 0.000000e+00 : f32
    %29 = vector.broadcast %cst_9 : f32 to vector<8x1xf32>
    %30 = arith.select %28, %22, %29 : vector<8x1xi1>, vector<8x1xf32>
    %c0_10 = arith.constant 0 : index
    %c0_11 = arith.constant 0 : index
    %31 = vector.load %arg4[%c0_10, %c0_11] : memref<1x1xf32, #tpu.memory_space<vmem>>, vector<1x1xf32>
    %32 = vector.shape_cast %30 : vector<8x1xf32> to vector<1x8x1xf32>
    %cst_12 = arith.constant dense<0.000000e+00> : vector<1xf32>
    %33 = vector.multi_reduction <add>, %32, %cst_12 [1, 2] : vector<1x8x1xf32> to vector<1xf32>
    %34 = vector.shape_cast %33 : vector<1xf32> to vector<1x1x1xf32>
    %35 = vector.extract %34[0, 0, 0] : f32 from vector<1x1x1xf32>
    %36 = vector.broadcast %35 : f32 to vector<1x1xf32>
    %37 = arith.addf %31, %36 : vector<1x1xf32>
    %c0_13 = arith.constant 0 : index
    %c0_14 = arith.constant 0 : index
    %38 = vector.load %arg4[%c0_13, %c0_14] : memref<1x1xf32, #tpu.memory_space<vmem>>, vector<1x1xf32>
    tpu.vector_store %arg4[%c0_13, %c0_14], %37 {strides = array<i32>} : memref<1x1xf32, #tpu.memory_space<vmem>>, vector<1x1xf32>,
    %c0_i32_15 = arith.constant 0 : i32
    %39 = arith.cmpi eq, %arg0, %c0_i32_15 : i32
    %40 = arith.extui %39 : i1 to i32
    %c0_i32_16 = arith.constant 0 : i32
    %41 = arith.cmpi ne, %40, %c0_i32_16 : i32
    scf.if %41 {
      %c0_17 = arith.constant 0 : index
      %c0_18 = arith.constant 0 : index
      %42 = vector.load %arg4[%c0_17, %c0_18] : memref<1x1xf32, #tpu.memory_space<vmem>>, vector<1x1xf32>
      %cst_19 = arith.constant 1.250000e-01 : f32
      %43 = vector.broadcast %cst_19 : f32 to vector<1x1xf32>
      %44 = arith.mulf %42, %43 : vector<1x1xf32>
      %c0_20 = arith.constant 0 : index
      %c0_21 = arith.constant 0 : index
      %45 = vector.load %arg3[%c0_20, %c0_21] : memref<1x1xf32, #tpu.memory_space<vmem>>, vector<1x1xf32>
      tpu.vector_store %arg3[%c0_20, %c0_21], %44 {strides = array<i32>} : memref<1x1xf32, #tpu.memory_space<vmem>>, vector<1x1xf32>,
    } else {
    }
    return
  }
  func.func @transform_0(%arg0: i32) -> (i32, i32) {
    %c0_i32 = arith.constant 0 : i32
    %c0_i32_0 = arith.constant 0 : i32
    return %arg0, %c0_i32 : i32, i32
  }
  func.func @transform_1(%arg0: i32) -> (i32, i32) {
    %c0_i32 = arith.constant 0 : i32
    %c0_i32_0 = arith.constant 0 : i32
    return %arg0, %c0_i32 : i32, i32
  }
  func.func @transform_2(%arg0: i32) -> (i32, i32) {
    %c0_i32 = arith.constant 0 : i32
    %c0_i32_0 = arith.constant 0 : i32
    %c0_i32_1 = arith.constant 0 : i32
    return %c0_i32, %c0_i32_0 : i32, i32
  }
}

</mosaic_0001>

<bundles_post_ra>
// kernel: tpu_custom_call.1
= control target key start
LH: loop header
LB: loop body
LE: loop exit
PB: predicated region body
PF: predicated region fallthrough
CT: control target
= control target key end

     0   :  { %vm19_vm0 = vcmask 261120   ;;  %s157_s0 = inlined_call_operand.vmem [shape: f32[8,32], index: 0, kind: input, shape index: {}]   ;;  %s158_s1 = inlined_call_operand.vmem [shape: s32[8,1], index: 1, kind: input, shape index: {}]   ;;  %s159_s2 = inlined_call_operand.hbm [shape: f32[1,1], index: 2, kind: output, shape index: {}]  }
   0x1   :  { %v18_v0 = vld [vmem:[%s157_s0] sm:$0xff] }
   0x2   :  { %7 = vsyncpa [#allocation4], 0  ;;  %v20_v1 = vsel %vm19_vm0, %v18_v0, -inf  ;;  %v124_v2 = vmov 0   ;;  %v33_v3 = vld [vmem:[%s158_s1] sm:$0xff]  ;;  %v31_v9 = vlaneseq  ;;  %vm51_vm2 = vcmask 7168  }
   0x3   :  { %93 = vset.pattern.permute.xlu0 %v124_v2  ;;  %vm16_vm3 = vcmask 0   ;;  %v125_v20 = vmov 0.0   ;;  %s126_s1 = smov [#allocation3]   ;;  %s79_s16 = sshll.u32 %s159_s2, 4  ;;  %s80_s16 = int_to_ptr.hbm [resolvable:$true] %s79_s16 }
   0x4   :  { %21 = vmax.xlane.f32.xlu0 %v20_v1  ;;  %v32_v10 = vand.u32 127, %v31_v9  ;;  %17 = vst.msk [vmem:[#allocation2] sm:$0x1] %vm16_vm3, %v125_v20  ;;  %s77_s13 = sshll.u32 %s126_s1, 4  ;;  %s78_s13 = int_to_ptr.vmem [resolvable:$true] %s77_s13 }
   0xb   :  { %v50_v28 = vld [vmem:[#allocation2] sm:$0x1] }
  0x18   :  { %35 = vperm.xlu0 %93, %v33_v3  }
  0x77   :  { %v22_v4 = vpop.xlane.xlu0 %21 }
  0x78   :  { %v23_v5 = vsub.f32 %v18_v0, %v22_v4 }
  0x7a   :  { %v24_v6 = vmul.f32 1.442695, %v23_v5 }
  0x7c   :  { %94 = vpow2.f32 %v24_v6 }
  0x82   :  { %v95_v7 = vpop.eup %94 }
  0x83   :  { %v26_v8 = vsel %vm19_vm0, %v95_v7, 0.0 }
  0x84   :  { %27 = vadd.xlane.f32.xlu1 %v26_v8 }
  0x8a   :  { %v36_v11 = vpop.permute.xlu0 %35 }
  0x8b   :  { %vm37_vm1 = vcmp.eq.s32.totalorder %v32_v10, %v36_v11 }
  0x8c   :  { %v38_v12 = vsel %vm37_vm1, %v23_v5, 0.0 }
  0x8d   :  { %v39_v13 = vsel %vm19_vm0, %v38_v12, 0.0 }
  0x8e   :  { %40 = vadd.xlane.f32.xlu1 %v39_v13 }
  0xf7   :  { %v28_v14 = vpop.xlane.xlu1 %27 }
  0xf8   :  { %96 = vlog2.f32 %v28_v14 }
  0xfe   :  { %v97_v15 = vpop.eup %96 }
  0xff   :  { %v30_v16 = vmul.f32 0.6931472, %v97_v15 }
 0x101   :  { %v41_v17 = vpop.xlane.xlu1 %40 }
 0x102   :  { %v42_v18 = vsub.f32 %v30_v16, %v41_v17 }
 0x104   :  { %v52_v19 = vsel %vm51_vm2, %v42_v18, 0.0 }
 0x105   :  { %53 = vadd.xlane.f32.xlu2 %v52_v19 }
 0x178   :  { %v54_v21 = vpop.xlane.xlu2 %53 }
 0x179   :  { %v55_v22 = vrot.slane %v54_v21, 4 }
 0x17b   :  { %v56_v23 = vadd.f32 %v55_v22, %v54_v21 }
 0x17d   :  { %v57_v24 = vrot.slane %v56_v23, 2 }
 0x17f   :  { %v58_v25 = vadd.f32 %v57_v24, %v56_v23 }
 0x181   :  { %v59_v26 = vrot.slane %v58_v25, 1 }
 0x183   :  { %v60_v27 = vadd.f32 %v59_v26, %v58_v25 }
 0x185   :  { %88 = vpush %v60_v27 }
 0x1b6   :  { %s89_s0 = spop %88 }
 0x1b7   :  { %v62_v29 = vstv %s89_s0 }
 0x1b8   :  { %v63_v30 = vadd.f32 %v62_v29, %v50_v28 }
 0x1ba   :  { %65 = vst.msk [vmem:[#allocation2] sm:$0x1] %vm16_vm3, %v63_v30 }
 0x1c1   :  { %v69_v31 = vld [vmem:[#allocation2] sm:$0x1] }
 0x1c2   :  { %v70_v32 = vmul.f32 0.125, %v69_v31 }
 0x1c4   :  { %71 = vst.msk [vmem:[#allocation3] sm:$0x1] %vm16_vm3, %v70_v32 }
 0x1c5   :  { %82 = dma.vmem_to_hbm [thread:$0]  %s78_s13, 16, %s80_s16, [#allocation4]  }
 0x1c6   :  { %122 = dma.done.wait [#allocation4], 16  }
 0x1c7   :  { %123 = vsyncadd [#allocation4], 4294967280 }
 0x1c8   :  { %87 = vsyncpa [#allocation4], 1 }

</bundles_post_ra>
